<compile_context>
chip_gen: v6e
topology: v6e:2x2x1
jax: 0.10.0
libtpu: 0.0.40
codegen_flags: <defaults>
</compile_context>

<pallas_src>
import functools

import numpy as np
import jax
import jax.numpy as jnp
from jax.experimental import pallas as pl
from jax.experimental.pallas import tpu as pltpu


# ----------------------------------------------------------------------------
# Kernels
# ----------------------------------------------------------------------------
def _conv_core(a, t_ref, y_ref, s_ref, img_h):
    """3x3 conv on a lane-folded (rows, W*Cin) slab -> lane-dense (rows, W*Cout).

    `rows` may cover several whole images stacked along sublanes, so the
    vertical-halo masks are per-image (row % img_h) and the rolls never bleed
    across image boundaries.  Horizontal taps + W zero padding are folded
    into the Toeplitz weight, so each kh tap is one MXU matmul.  Also emits
    (sum, sum^2) per-lane BatchNorm partials with a single store.
    """
    rows = a.shape[0]
    row = jax.lax.broadcasted_iota(jnp.int32, a.shape, 0)
    if (img_h & (img_h - 1)) == 0:            # power-of-two H: cheap bitwise mod
        rloc = row & (img_h - 1)
    else:
        rloc = jax.lax.rem(row, img_h)
    # a_up[r] = a[r-1] (zero at each image's top edge); a_dn[r] = a[r+1].
    a_up = jnp.where(rloc >= 1, pltpu.roll(a, shift=1, axis=0), 0.0)
    a_dn = jnp.where(rloc <= img_h - 2,
                     pltpu.roll(a, shift=rows - 1, axis=0), 0.0)

    acc = jnp.dot(a_up, t_ref[0], preferred_element_type=jnp.float32)
    acc = acc + jnp.dot(a, t_ref[1], preferred_element_type=jnp.float32)
    acc = acc + jnp.dot(a_dn, t_ref[2], preferred_element_type=jnp.float32)

    y_ref[...] = acc
    # Per-lane partial statistics, written in ONE store (finalized outside).
    s_ref[...] = jnp.concatenate(
        [jnp.sum(acc, axis=0, keepdims=True),
         jnp.sum(acc * acc, axis=0, keepdims=True)], axis=0)


def _conv_stats_kernel(x_ref, t_ref, y_ref, s_ref, *, img_h):
    """conv1: raw conv + BN partial stats."""
    _conv_core(x_ref[...], t_ref, y_ref, s_ref, img_h)


def _bnrelu_conv_stats_kernel(x_ref, sc_ref, sh_ref, t_ref, y_ref, s_ref, *, img_h):
    """conv2: fuse BN1 affine + ReLU into the input read, then conv + stats."""
    a = jnp.maximum(x_ref[...] * sc_ref[...] + sh_ref[...], 0.0)
    _conv_core(a, t_ref, y_ref, s_ref, img_h)


def _bn_relu_kernel(y_ref, sc_ref, sh_ref, o_ref):
    """Final BN2 affine + ReLU on fat lane-dense row tiles."""
    o_ref[...] = jnp.maximum(y_ref[...] * sc_ref[...] + sh_ref[...], 0.0)


# ----------------------------------------------------------------------------
# Grid / tile selection helpers
# ----------------------------------------------------------------------------
def _pick_conv_steps(n):
    """Smallest divisor of N that is >= 2 (keeps both v7x TensorCores fed),
    never one step per image: single-TC v5e/v6e get few fat slabs instead of
    a serial per-image loop.  Falls back to 1 (N==1) or N (prime N)."""
    if n == 1:
        return 1
    for s in range(2, n + 1):
        if n % s == 0:
            return s
    return n


def _pick_row_tile(total_rows, cap=1024):
    """Fattest row tile that divides total_rows (multiple of 8 when tiling)
    and stays <= cap rows — few fat steps instead of one-vreg (8,128) tiles."""
    if total_rows <= cap:
        return total_rows
    for t in range(cap, 7, -1):
        if total_rows % t == 0 and t % 8 == 0:
            return t
    return total_rows


def _pad_cin_for_lanes(cin, w):
    """Smallest cin' >= cin with (w*cin') % 128 == 0 (full lane density),
    without more than doubling the folded width."""
    if (w * cin) % 128 == 0:
        return cin
    for cin_p in range(cin + 1, 2 * cin + 1):
        if (w * cin_p) % 128 == 0:
            return cin_p
    return cin


# ----------------------------------------------------------------------------
# pallas_call wrappers
# ----------------------------------------------------------------------------
def _conv3x3_stats(x_flat, t, img_h, steps, scale_row=None, shift_row=None):
    """One conv stage.  x_flat: (N*H, W*Cin); t: (3, W*Cin, W*Cout)."""
    total_rows, wc_in = x_flat.shape
    wc_out = t.shape[-1]

    rows_per_step = total_rows // steps
    if steps > 1 and rows_per_step % 8 != 0:
        steps, rows_per_step = 1, total_rows   # keep blocks (8,128)-legal

    out_shape = (jax.ShapeDtypeStruct((total_rows, wc_out), jnp.float32),
                 jax.ShapeDtypeStruct((steps, 2, wc_out), jnp.float32))
    out_specs = (pl.BlockSpec((rows_per_step, wc_out), lambda i: (i, 0)),
                 pl.BlockSpec((None, 2, wc_out), lambda i: (i, 0, 0)))

    if scale_row is None:
        kernel = functools.partial(_conv_stats_kernel, img_h=img_h)
        in_specs = [pl.BlockSpec((rows_per_step, wc_in), lambda i: (i, 0)),
                    pl.BlockSpec((3, wc_in, wc_out), lambda i: (0, 0, 0))]
        args = (x_flat, t)
    else:
        kernel = functools.partial(_bnrelu_conv_stats_kernel, img_h=img_h)
        in_specs = [pl.BlockSpec((rows_per_step, wc_in), lambda i: (i, 0)),
                    pl.BlockSpec((1, wc_in), lambda i: (0, 0)),
                    pl.BlockSpec((1, wc_in), lambda i: (0, 0)),
                    pl.BlockSpec((3, wc_in, wc_out), lambda i: (0, 0, 0))]
        args = (x_flat, scale_row, shift_row, t)

    return pl.pallas_call(
        kernel,
        out_shape=out_shape,
        grid=(steps,),
        in_specs=in_specs,
        out_specs=out_specs,
        compiler_params=pltpu.CompilerParams(
            dimension_semantics=("parallel",)),
    )(*args)


def _bn_relu(y_flat, scale_row, shift_row, tile_rows):
    """Final BN+ReLU pass over the flat (N*H, W*C) slab, fat lane-dense tiles."""
    total_rows, wc = y_flat.shape
    return pl.pallas_call(
        _bn_relu_kernel,
        out_shape=jax.ShapeDtypeStruct((total_rows, wc), jnp.float32),
        grid=(total_rows // tile_rows,),
        in_specs=[pl.BlockSpec((tile_rows, wc), lambda i: (i, 0)),
                  pl.BlockSpec((1, wc), lambda i: (0, 0)),
                  pl.BlockSpec((1, wc), lambda i: (0, 0))],
        out_specs=pl.BlockSpec((tile_rows, wc), lambda i: (i, 0)),
        compiler_params=pltpu.CompilerParams(
            dimension_semantics=("parallel",)),
    )(y_flat, scale_row, shift_row)


# ----------------------------------------------------------------------------
# Weight / stats plumbing (tiny XLA-side helpers)
# ----------------------------------------------------------------------------
def _toeplitz_weight(w_hwio, w_spatial):
    """(3,3,Cin,Cout) HWIO -> (3, W*Cin, W*Cout) Toeplitz factor.

    T[kh, w_in*Cin+ci, w*Cout+co] = w[kh, w_in-w+1, ci, co] when the tap is
    inside the 3x3 window, else 0 -> a single matmul against a lane-folded
    (rows, W*Cin) slab implements all kw taps AND the zero padding along W.
    """
    _, _, cin, cout = w_hwio.shape
    sel = np.zeros((3, w_spatial, w_spatial), np.float32)
    for kw in range(3):
        for w in range(w_spatial):
            w_in = w + kw - 1
            if 0 <= w_in < w_spatial:
                sel[kw, w_in, w] = 1.0
    t = jnp.einsum("hkic,kxw->hxiwc", w_hwio, jnp.asarray(sel))
    return t.reshape(3, w_spatial * cin, w_spatial * cout)


def _grouped_to_dense_hwio(w_oihw_grouped, groups):
    """PyTorch grouped OIHW (Cout, Cin//g, 3, 3) -> block-diagonal dense HWIO.

    Fine at these tiny per-group channel counts (MXU has slack); for real
    channel counts use a per-group grid axis instead (see TODO at top).
    """
    cout, cin_g, kh, kw = w_oihw_grouped.shape
    cout_g = cout // groups
    w = jnp.zeros((kh, kw, cin_g * groups, cout), w_oihw_grouped.dtype)
    for g in range(groups):
        blk = jnp.transpose(
            w_oihw_grouped[g * cout_g:(g + 1) * cout_g], (2, 3, 1, 0))
        w = w.at[:, :, g * cin_g:(g + 1) * cin_g,
                 g * cout_g:(g + 1) * cout_g].set(blk)
    return w


def _bn_scale_shift(stats, gamma, beta, w_spatial, count, eps=1e-5):
    """Finalize BN: reduce per-step/per-lane partials -> tiled scale/shift.

    NOTE: variance uses E[x^2]-E[x]^2 from f32 partials; fine at these
    reduction sizes (passes 1e-3 vs centered reference); for very large
    N*H*W switch to a compensated/Welford finalize.
    """
    c = gamma.shape[0]
    s = stats.reshape(stats.shape[0], 2, w_spatial, c).sum(axis=(0, 2))  # (2,C)
    mean = s[0] / count
    var = jnp.maximum(s[1] / count - mean * mean, 0.0)   # biased var (train mode)
    scale = gamma * jax.lax.rsqrt(var + eps)
    shift = beta - mean * scale
    # Tile per-channel params across W so they broadcast over the folded lanes.
    return (jnp.tile(scale, w_spatial).reshape(1, w_spatial * c),
            jnp.tile(shift, w_spatial).reshape(1, w_spatial * c))


# ----------------------------------------------------------------------------
# EncoderBlock forward
# ----------------------------------------------------------------------------
def init_encoder_block_params(key, in_channel, out_channel, groups=4):
    """Parameters in PyTorch-native shapes (OIHW conv weights, conv2 grouped)."""
    assert out_channel % groups == 0
    k1, k2, k3, k4 = jax.random.split(key, 4)
    return dict(
        w1=0.1 * jax.random.normal(k1, (out_channel, in_channel, 3, 3), jnp.float32),
        b1=0.1 * jax.random.normal(k2, (out_channel,), jnp.float32),  # cancelled by BN
        g1=jnp.ones((out_channel,), jnp.float32),
        bt1=jnp.zeros((out_channel,), jnp.float32),
        w2=0.1 * jax.random.normal(
            k3, (out_channel, out_channel // groups, 3, 3), jnp.float32),
        b2=0.1 * jax.random.normal(k4, (out_channel,), jnp.float32),  # cancelled by BN
        g2=jnp.ones((out_channel,), jnp.float32),
        bt2=jnp.zeros((out_channel,), jnp.float32),
    )


@functools.partial(jax.jit, static_argnames=("groups",))
def encoder_block_forward(x_nchw, params, groups=4):
    """EncoderBlock.forward; input/output are NCHW like the PyTorch module."""
    n, cin, h, w = x_nchw.shape
    cout = params["w1"].shape[0]

    # Single layout change at the module boundary: NCHW -> flat lane-folded
    # (N*H, W*C).  Conv1's input channels are zero-padded so the folded width
    # is a full 128-lane multiple (unmasked loads, full-lane halo/VPU work).
    cin_p = _pad_cin_for_lanes(cin, w)
    x = jnp.transpose(x_nchw, (0, 2, 3, 1))                      # NHWC
    if cin_p != cin:
        x = jnp.pad(x, ((0, 0), (0, 0), (0, 0), (0, cin_p - cin)))
    x = x.reshape(n * h, w * cin_p)

    steps = _pick_conv_steps(n)   # >=2 fat slabs when possible (v7x 2 TCs)

    # conv_bn1 ---------------------------------------------------------------
    w1_hwio = jnp.transpose(params["w1"], (2, 3, 1, 0))          # (3,3,cin,cout)
    if cin_p != cin:
        w1_hwio = jnp.pad(w1_hwio, ((0, 0), (0, 0), (0, cin_p - cin), (0, 0)))
    t1 = _toeplitz_weight(w1_hwio, w)
    # NOTE: the conv bias is exactly cancelled by the training-mode BN mean
    # subtraction, so it is intentionally not applied.
    y1, st1 = _conv3x3_stats(x, t1, h, steps)
    sc1, sh1 = _bn_scale_shift(st1, params["g1"], params["bt1"], w, n * h * w)

    # conv_bn2 (groups=4): BN1 affine + ReLU fused into conv2's input read ---
    w2_hwio = _grouped_to_dense_hwio(params["w2"], groups)
    t2 = _toeplitz_weight(w2_hwio, w)
    y2, st2 = _conv3x3_stats(y1, t2, h, steps, sc1, sh1)
    sc2, sh2 = _bn_scale_shift(st2, params["g2"], params["bt2"], w, n * h * w)

    # Final BN2 + ReLU over the flat slab with the fattest legal row tile.
    tile_rows = _pick_row_tile(n * h)
    out = _bn_relu(y2, sc2, sh2, tile_rows)

    return jnp.transpose(out.reshape(n, h, w, cout), (0, 3, 1, 2))


# ----------------------------------------------------------------------------
# Pure-JAX reference (for correctness verification only)
# ----------------------------------------------------------------------------
def _reference_forward(x_nchw, params, groups=4):
    def conv_bn_relu(x, w_oihw, b, gamma, beta, grp):
        y = jax.lax.conv_general_dilated(
            x, w_oihw, window_strides=(1, 1), padding=((1, 1), (1, 1)),
            dimension_numbers=("NCHW", "OIHW", "NCHW"),
            feature_group_count=grp)
        y = y + b.reshape(1, -1, 1, 1)
        mean = jnp.mean(y, axis=(0, 2, 3), keepdims=True)
        var = jnp.mean((y - mean) ** 2, axis=(0, 2, 3), keepdims=True)
        y = (y - mean) * jax.lax.rsqrt(var + 1e-5)
        y = y * gamma.reshape(1, -1, 1, 1) + beta.reshape(1, -1, 1, 1)
        return jnp.maximum(y, 0.0)

    x = conv_bn_relu(x_nchw, params["w1"], params["b1"],
                     params["g1"], params["bt1"], 1)
    x = conv_bn_relu(x, params["w2"], params["b2"],
                     params["g2"], params["bt2"], groups)
    return x


if __name__ == "__main__":
    key = jax.random.PRNGKey(0)
    kx, kp = jax.random.split(key)

    in_channel, out_channel = 4, 8
    x = jax.random.normal(kx, (2, in_channel, 16, 16), dtype=jnp.float32)
    params = init_encoder_block_params(kp, in_channel, out_channel, groups=4)

    out = encoder_block_forward(x, params)
    out = jax.block_until_ready(out)
    assert out.shape == (2, out_channel, 16, 16)
    assert bool(jnp.all(out >= 0.0))  # ReLU output

    ref = _reference_forward(x, params)
    max_err = float(jnp.max(jnp.abs(out - ref)))
    assert bool(jnp.allclose(out, ref, atol=1e-3, rtol=1e-3)), max_err

    print("KERNEL_OK")
</pallas_src>

<mosaic_0001>
module attributes {stable_mosaic.version = 11 : i64} {
  func.func @_conv_stats_kernel(%arg0: i32, %arg1: memref<16x128xf32, #tpu.memory_space<vmem>>, %arg2: memref<3x128x128xf32, #tpu.memory_space<vmem>>, %arg3: memref<16x128xf32, #tpu.memory_space<vmem>>, %arg4: memref<1x2x128xf32, #tpu.memory_space<vmem>>) attributes {dimension_semantics = [#tpu.dimension_semantics<parallel>], iteration_bounds = array<i64: 2>, scalar_prefetch = 0 : i64, scratch_operands = 0 : i64, tpu.core_type = #tpu.core_type<tc>, window_params = [{transform_indices = @transform_0, window_bounds = array<i64: 16, 128>}, {pipeline_mode = #tpu.pipeline_mode<synchronous>, transform_indices = @transform_1, window_bounds = array<i64: 3, 128, 128>}, {transform_indices = @transform_2, window_bounds = array<i64: 16, 128>}, {transform_indices = @transform_3, window_bounds = array<i64: 1, 2, 128>}]} {
    %c0 = arith.constant 0 : index
    %c0_0 = arith.constant 0 : index
    %0 = vector.load %arg1[%c0, %c0_0] : memref<16x128xf32, #tpu.memory_space<vmem>>, vector<16x128xf32>
    %1 = tpu.iota {dimensions = array<i32: 0>} : vector<16x128xi32>
    %c15_i32 = arith.constant 15 : i32
    %2 = vector.broadcast %c15_i32 : i32 to vector<16x128xi32>
    %3 = arith.andi %1, %2 : vector<16x128xi32>
    %c1_i32 = arith.constant 1 : i32
    %4 = vector.broadcast %c1_i32 : i32 to vector<16x128xi32>
    %5 = arith.cmpi sge, %3, %4 : vector<16x128xi32>
    %c1_i32_1 = arith.constant 1 : i32
    %6 = tpu.dynamic_rotate %0 by %c1_i32_1 dim 0 : vector<16x128xf32>, i32 -> vector<16x128xf32>
    %cst = arith.constant 0.000000e+00 : f32
    %7 = vector.broadcast %cst : f32 to vector<16x128xf32>
    %8 = arith.select %5, %6, %7 : vector<16x128xi1>, vector<16x128xf32>
    %c14_i32 = arith.constant 14 : i32
    %9 = vector.broadcast %c14_i32 : i32 to vector<16x128xi32>
    %10 = arith.cmpi sle, %3, %9 : vector<16x128xi32>
    %c15_i32_2 = arith.constant 15 : i32
    %11 = tpu.dynamic_rotate %0 by %c15_i32_2 dim 0 : vector<16x128xf32>, i32 -> vector<16x128xf32>
    %cst_3 = arith.constant 0.000000e+00 : f32
    %12 = vector.broadcast %cst_3 : f32 to vector<16x128xf32>
    %13 = arith.select %10, %11, %12 : vector<16x128xi1>, vector<16x128xf32>
    %c0_4 = arith.constant 0 : index
    %c0_5 = arith.constant 0 : index
    %c0_6 = arith.constant 0 : index
    %14 = vector.load %arg2[%c0_4, %c0_5, %c0_6] : memref<3x128x128xf32, #tpu.memory_space<vmem>>, vector<1x128x128xf32>
    %15 = vector.shape_cast %14 : vector<1x128x128xf32> to vector<128x128xf32>
    %cst_7 = arith.constant dense<0.000000e+00> : vector<16x128xf32>
    %16 = tpu.matmul %8, %15, %cst_7 {dimension_numbers = #tpu.dot_dimension_numbers<[1], [0], [0], [1], [0, 0, 1, 1], [], []>} : vector<16x128xf32>, vector<128x128xf32>, vector<16x128xf32> -> vector<16x128xf32>
    %c1 = arith.constant 1 : index
    %c0_8 = arith.constant 0 : index
    %c0_9 = arith.constant 0 : index
    %17 = vector.load %arg2[%c1, %c0_8, %c0_9] : memref<3x128x128xf32, #tpu.memory_space<vmem>>, vector<1x128x128xf32>
    %18 = vector.shape_cast %17 : vector<1x128x128xf32> to vector<128x128xf32>
    %cst_10 = arith.constant dense<0.000000e+00> : vector<16x128xf32>
    %19 = tpu.matmul %0, %18, %cst_10 {dimension_numbers = #tpu.dot_dimension_numbers<[1], [0], [0], [1], [0, 0, 1, 1], [], []>} : vector<16x128xf32>, vector<128x128xf32>, vector<16x128xf32> -> vector<16x128xf32>
    %20 = arith.addf %16, %19 : vector<16x128xf32>
    %c2 = arith.constant 2 : index
    %c0_11 = arith.constant 0 : index
    %c0_12 = arith.constant 0 : index
    %21 = vector.load %arg2[%c2, %c0_11, %c0_12] : memref<3x128x128xf32, #tpu.memory_space<vmem>>, vector<1x128x128xf32>
    %22 = vector.shape_cast %21 : vector<1x128x128xf32> to vector<128x128xf32>
    %cst_13 = arith.constant dense<0.000000e+00> : vector<16x128xf32>
    %23 = tpu.matmul %13, %22, %cst_13 {dimension_numbers = #tpu.dot_dimension_numbers<[1], [0], [0], [1], [0, 0, 1, 1], [], []>} : vector<16x128xf32>, vector<128x128xf32>, vector<16x128xf32> -> vector<16x128xf32>
    %24 = arith.addf %20, %23 : vector<16x128xf32>
    %c0_14 = arith.constant 0 : index
    %c0_15 = arith.constant 0 : index
    %25 = vector.load %arg3[%c0_14, %c0_15] : memref<16x128xf32, #tpu.memory_space<vmem>>, vector<16x128xf32>
    tpu.vector_store %arg3[%c0_14, %c0_15], %24 {strides = array<i32>} : memref<16x128xf32, #tpu.memory_space<vmem>>, vector<16x128xf32>,
    %cst_16 = arith.constant dense<0.000000e+00> : vector<128xf32>
    %26 = vector.multi_reduction <add>, %24, %cst_16 [0] : vector<16x128xf32> to vector<128xf32>
    %27 = vector.shape_cast %26 : vector<128xf32> to vector<1x128xf32>
    %28 = arith.mulf %24, %24 : vector<16x128xf32>
    %cst_17 = arith.constant dense<0.000000e+00> : vector<128xf32>
    %29 = vector.multi_reduction <add>, %28, %cst_17 [0] : vector<16x128xf32> to vector<128xf32>
    %30 = vector.shape_cast %29 : vector<128xf32> to vector<1x128xf32>
    %31 = tpu.concatenate %27, %30 in 0 : vector<1x128xf32>, vector<1x128xf32> -> vector<2x128xf32>
    %c0_18 = arith.constant 0 : index
    %c0_19 = arith.constant 0 : index
    %c0_20 = arith.constant 0 : index
    %32 = vector.load %arg4[%c0_18, %c0_19, %c0_20] : memref<1x2x128xf32, #tpu.memory_space<vmem>>, vector<1x2x128xf32>
    %33 = vector.shape_cast %32 : vector<1x2x128xf32> to vector<2x128xf32>
    %34 = vector.shape_cast %31 : vector<2x128xf32> to vector<1x2x128xf32>
    tpu.vector_store %arg4[%c0_18, %c0_19, %c0_20], %34 {strides = array<i32>} : memref<1x2x128xf32, #tpu.memory_space<vmem>>, vector<1x2x128xf32>,
    return
  }
  func.func @transform_0(%arg0: i32) -> (i32, i32) {
    %c0_i32 = arith.constant 0 : i32
    %c0_i32_0 = arith.constant 0 : i32
    return %arg0, %c0_i32 : i32, i32
  }
  func.func @transform_1(%arg0: i32) -> (i32, i32, i32) {
    %c0_i32 = arith.constant 0 : i32
    %c0_i32_0 = arith.constant 0 : i32
    %c0_i32_1 = arith.constant 0 : i32
    %c0_i32_2 = arith.constant 0 : i32
    return %c0_i32, %c0_i32_0, %c0_i32_1 : i32, i32, i32
  }
  func.func @transform_2(%arg0: i32) -> (i32, i32) {
    %c0_i32 = arith.constant 0 : i32
    %c0_i32_0 = arith.constant 0 : i32
    return %arg0, %c0_i32 : i32, i32
  }
  func.func @transform_3(%arg0: i32) -> (i32, i32, i32) {
    %c0_i32 = arith.constant 0 : i32
    %c0_i32_0 = arith.constant 0 : i32
    %c0_i32_1 = arith.constant 0 : i32
    return %arg0, %c0_i32, %c0_i32_0 : i32, i32, i32
  }
}

module attributes {stable_mosaic.version = 11 : i64} {
  func.func @_bnrelu_conv_stats_kernel(%arg0: i32, %arg1: memref<16x128xf32, #tpu.memory_space<vmem>>, %arg2: memref<1x128xf32, #tpu.memory_space<vmem>>, %arg3: memref<1x128xf32, #tpu.memory_space<vmem>>, %arg4: memref<3x128x128xf32, #tpu.memory_space<vmem>>, %arg5: memref<16x128xf32, #tpu.memory_space<vmem>>, %arg6: memref<1x2x128xf32, #tpu.memory_space<vmem>>) attributes {dimension_semantics = [#tpu.dimension_semantics<parallel>], iteration_bounds = array<i64: 2>, scalar_prefetch = 0 : i64, scratch_operands = 0 : i64, tpu.core_type = #tpu.core_type<tc>, window_params = [{transform_indices = @transform_0, window_bounds = array<i64: 16, 128>}, {pipeline_mode = #tpu.pipeline_mode<synchronous>, transform_indices = @transform_1, window_bounds = array<i64: 1, 128>}, {pipeline_mode = #tpu.pipeline_mode<synchronous>, transform_indices = @transform_2, window_bounds = array<i64: 1, 128>}, {pipeline_mode = #tpu.pipeline_mode<synchronous>, transform_indices = @transform_3, window_bounds = array<i64: 3, 128, 128>}, {transform_indices = @transform_4, window_bounds = array<i64: 16, 128>}, {transform_indices = @transform_5, window_bounds = array<i64: 1, 2, 128>}]} {
    %c0 = arith.constant 0 : index
    %c0_0 = arith.constant 0 : index
    %0 = vector.load %arg1[%c0, %c0_0] : memref<16x128xf32, #tpu.memory_space<vmem>>, vector<16x128xf32>
    %c0_1 = arith.constant 0 : index
    %c0_2 = arith.constant 0 : index
    %1 = vector.load %arg2[%c0_1, %c0_2] : memref<1x128xf32, #tpu.memory_space<vmem>>, vector<1x128xf32>
    %2 = vector.broadcast %1 : vector<1x128xf32> to vector<16x128xf32>
    %3 = arith.mulf %0, %2 : vector<16x128xf32>
    %c0_3 = arith.constant 0 : index
    %c0_4 = arith.constant 0 : index
    %4 = vector.load %arg3[%c0_3, %c0_4] : memref<1x128xf32, #tpu.memory_space<vmem>>, vector<1x128xf32>
    %5 = vector.broadcast %4 : vector<1x128xf32> to vector<16x128xf32>
    %6 = arith.addf %3, %5 : vector<16x128xf32>
    %cst = arith.constant 0.000000e+00 : f32
    %7 = vector.broadcast %cst : f32 to vector<16x128xf32>
    %8 = arith.maximumf %6, %7 : vector<16x128xf32>
    %9 = tpu.iota {dimensions = array<i32: 0>} : vector<16x128xi32>
    %c15_i32 = arith.constant 15 : i32
    %10 = vector.broadcast %c15_i32 : i32 to vector<16x128xi32>
    %11 = arith.andi %9, %10 : vector<16x128xi32>
    %c1_i32 = arith.constant 1 : i32
    %12 = vector.broadcast %c1_i32 : i32 to vector<16x128xi32>
    %13 = arith.cmpi sge, %11, %12 : vector<16x128xi32>
    %c1_i32_5 = arith.constant 1 : i32
    %14 = tpu.dynamic_rotate %8 by %c1_i32_5 dim 0 : vector<16x128xf32>, i32 -> vector<16x128xf32>
    %cst_6 = arith.constant 0.000000e+00 : f32
    %15 = vector.broadcast %cst_6 : f32 to vector<16x128xf32>
    %16 = arith.select %13, %14, %15 : vector<16x128xi1>, vector<16x128xf32>
    %c14_i32 = arith.constant 14 : i32
    %17 = vector.broadcast %c14_i32 : i32 to vector<16x128xi32>
    %18 = arith.cmpi sle, %11, %17 : vector<16x128xi32>
    %c15_i32_7 = arith.constant 15 : i32
    %19 = tpu.dynamic_rotate %8 by %c15_i32_7 dim 0 : vector<16x128xf32>, i32 -> vector<16x128xf32>
    %cst_8 = arith.constant 0.000000e+00 : f32
    %20 = vector.broadcast %cst_8 : f32 to vector<16x128xf32>
    %21 = arith.select %18, %19, %20 : vector<16x128xi1>, vector<16x128xf32>
    %c0_9 = arith.constant 0 : index
    %c0_10 = arith.constant 0 : index
    %c0_11 = arith.constant 0 : index
    %22 = vector.load %arg4[%c0_9, %c0_10, %c0_11] : memref<3x128x128xf32, #tpu.memory_space<vmem>>, vector<1x128x128xf32>
    %23 = vector.shape_cast %22 : vector<1x128x128xf32> to vector<128x128xf32>
    %cst_12 = arith.constant dense<0.000000e+00> : vector<16x128xf32>
    %24 = tpu.matmul %16, %23, %cst_12 {dimension_numbers = #tpu.dot_dimension_numbers<[1], [0], [0], [1], [0, 0, 1, 1], [], []>} : vector<16x128xf32>, vector<128x128xf32>, vector<16x128xf32> -> vector<16x128xf32>
    %c1 = arith.constant 1 : index
    %c0_13 = arith.constant 0 : index
    %c0_14 = arith.constant 0 : index
    %25 = vector.load %arg4[%c1, %c0_13, %c0_14] : memref<3x128x128xf32, #tpu.memory_space<vmem>>, vector<1x128x128xf32>
    %26 = vector.shape_cast %25 : vector<1x128x128xf32> to vector<128x128xf32>
    %cst_15 = arith.constant dense<0.000000e+00> : vector<16x128xf32>
    %27 = tpu.matmul %8, %26, %cst_15 {dimension_numbers = #tpu.dot_dimension_numbers<[1], [0], [0], [1], [0, 0, 1, 1], [], []>} : vector<16x128xf32>, vector<128x128xf32>, vector<16x128xf32> -> vector<16x128xf32>
    %28 = arith.addf %24, %27 : vector<16x128xf32>
    %c2 = arith.constant 2 : index
    %c0_16 = arith.constant 0 : index
    %c0_17 = arith.constant 0 : index
    %29 = vector.load %arg4[%c2, %c0_16, %c0_17] : memref<3x128x128xf32, #tpu.memory_space<vmem>>, vector<1x128x128xf32>
    %30 = vector.shape_cast %29 : vector<1x128x128xf32> to vector<128x128xf32>
    %cst_18 = arith.constant dense<0.000000e+00> : vector<16x128xf32>
    %31 = tpu.matmul %21, %30, %cst_18 {dimension_numbers = #tpu.dot_dimension_numbers<[1], [0], [0], [1], [0, 0, 1, 1], [], []>} : vector<16x128xf32>, vector<128x128xf32>, vector<16x128xf32> -> vector<16x128xf32>
    %32 = arith.addf %28, %31 : vector<16x128xf32>
    %c0_19 = arith.constant 0 : index
    %c0_20 = arith.constant 0 : index
    %33 = vector.load %arg5[%c0_19, %c0_20] : memref<16x128xf32, #tpu.memory_space<vmem>>, vector<16x128xf32>
    tpu.vector_store %arg5[%c0_19, %c0_20], %32 {strides = array<i32>} : memref<16x128xf32, #tpu.memory_space<vmem>>, vector<16x128xf32>,
    %cst_21 = arith.constant dense<0.000000e+00> : vector<128xf32>
    %34 = vector.multi_reduction <add>, %32, %cst_21 [0] : vector<16x128xf32> to vector<128xf32>
    %35 = vector.shape_cast %34 : vector<128xf32> to vector<1x128xf32>
    %36 = arith.mulf %32, %32 : vector<16x128xf32>
    %cst_22 = arith.constant dense<0.000000e+00> : vector<128xf32>
    %37 = vector.multi_reduction <add>, %36, %cst_22 [0] : vector<16x128xf32> to vector<128xf32>
    %38 = vector.shape_cast %37 : vector<128xf32> to vector<1x128xf32>
    %39 = tpu.concatenate %35, %38 in 0 : vector<1x128xf32>, vector<1x128xf32> -> vector<2x128xf32>
    %c0_23 = arith.constant 0 : index
    %c0_24 = arith.constant 0 : index
    %c0_25 = arith.constant 0 : index
    %40 = vector.load %arg6[%c0_23, %c0_24, %c0_25] : memref<1x2x128xf32, #tpu.memory_space<vmem>>, vector<1x2x128xf32>
    %41 = vector.shape_cast %40 : vector<1x2x128xf32> to vector<2x128xf32>
    %42 = vector.shape_cast %39 : vector<2x128xf32> to vector<1x2x128xf32>
    tpu.vector_store %arg6[%c0_23, %c0_24, %c0_25], %42 {strides = array<i32>} : memref<1x2x128xf32, #tpu.memory_space<vmem>>, vector<1x2x128xf32>,
    return
  }
  func.func @transform_0(%arg0: i32) -> (i32, i32) {
    %c0_i32 = arith.constant 0 : i32
    %c0_i32_0 = arith.constant 0 : i32
    return %arg0, %c0_i32 : i32, i32
  }
  func.func @transform_1(%arg0: i32) -> (i32, i32) {
    %c0_i32 = arith.constant 0 : i32
    %c0_i32_0 = arith.constant 0 : i32
    %c0_i32_1 = arith.constant 0 : i32
    return %c0_i32, %c0_i32_0 : i32, i32
  }
  func.func @transform_2(%arg0: i32) -> (i32, i32) {
    %c0_i32 = arith.constant 0 : i32
    %c0_i32_0 = arith.constant 0 : i32
    %c0_i32_1 = arith.constant 0 : i32
    return %c0_i32, %c0_i32_0 : i32, i32
  }
  func.func @transform_3(%arg0: i32) -> (i32, i32, i32) {
    %c0_i32 = arith.constant 0 : i32
    %c0_i32_0 = arith.constant 0 : i32
    %c0_i32_1 = arith.constant 0 : i32
    %c0_i32_2 = arith.constant 0 : i32
    return %c0_i32, %c0_i32_0, %c0_i32_1 : i32, i32, i32
  }
  func.func @transform_4(%arg0: i32) -> (i32, i32) {
    %c0_i32 = arith.constant 0 : i32
    %c0_i32_0 = arith.constant 0 : i32
    return %arg0, %c0_i32 : i32, i32
  }
  func.func @transform_5(%arg0: i32) -> (i32, i32, i32) {
    %c0_i32 = arith.constant 0 : i32
    %c0_i32_0 = arith.constant 0 : i32
    %c0_i32_1 = arith.constant 0 : i32
    return %arg0, %c0_i32, %c0_i32_0 : i32, i32, i32
  }
}

module attributes {stable_mosaic.version = 11 : i64} {
  func.func @_bn_relu_kernel(%arg0: i32, %arg1: memref<32x128xf32, #tpu.memory_space<vmem>>, %arg2: memref<1x128xf32, #tpu.memory_space<vmem>>, %arg3: memref<1x128xf32, #tpu.memory_space<vmem>>, %arg4: memref<32x128xf32, #tpu.memory_space<vmem>>) attributes {dimension_semantics = [#tpu.dimension_semantics<parallel>], iteration_bounds = array<i64: 1>, scalar_prefetch = 0 : i64, scratch_operands = 0 : i64, tpu.core_type = #tpu.core_type<tc>, window_params = [{transform_indices = @transform_0, window_bounds = array<i64: 32, 128>}, {pipeline_mode = #tpu.pipeline_mode<synchronous>, transform_indices = @transform_1, window_bounds = array<i64: 1, 128>}, {pipeline_mode = #tpu.pipeline_mode<synchronous>, transform_indices = @transform_2, window_bounds = array<i64: 1, 128>}, {transform_indices = @transform_3, window_bounds = array<i64: 32, 128>}]} {
    %c0 = arith.constant 0 : index
    %c0_0 = arith.constant 0 : index
    %0 = vector.load %arg1[%c0, %c0_0] : memref<32x128xf32, #tpu.memory_space<vmem>>, vector<32x128xf32>
    %c0_1 = arith.constant 0 : index
    %c0_2 = arith.constant 0 : index
    %1 = vector.load %arg2[%c0_1, %c0_2] : memref<1x128xf32, #tpu.memory_space<vmem>>, vector<1x128xf32>
    %2 = vector.broadcast %1 : vector<1x128xf32> to vector<32x128xf32>
    %3 = arith.mulf %0, %2 : vector<32x128xf32>
    %c0_3 = arith.constant 0 : index
    %c0_4 = arith.constant 0 : index
    %4 = vector.load %arg3[%c0_3, %c0_4] : memref<1x128xf32, #tpu.memory_space<vmem>>, vector<1x128xf32>
    %5 = vector.broadcast %4 : vector<1x128xf32> to vector<32x128xf32>
    %6 = arith.addf %3, %5 : vector<32x128xf32>
    %cst = arith.constant 0.000000e+00 : f32
    %7 = vector.broadcast %cst : f32 to vector<32x128xf32>
    %8 = arith.maximumf %6, %7 : vector<32x128xf32>
    %c0_5 = arith.constant 0 : index
    %c0_6 = arith.constant 0 : index
    %9 = vector.load %arg4[%c0_5, %c0_6] : memref<32x128xf32, #tpu.memory_space<vmem>>, vector<32x128xf32>
    tpu.vector_store %arg4[%c0_5, %c0_6], %8 {strides = array<i32>} : memref<32x128xf32, #tpu.memory_space<vmem>>, vector<32x128xf32>,
    return
  }
  func.func @transform_0(%arg0: i32) -> (i32, i32) {
    %c0_i32 = arith.constant 0 : i32
    %c0_i32_0 = arith.constant 0 : i32
    return %arg0, %c0_i32 : i32, i32
  }
  func.func @transform_1(%arg0: i32) -> (i32, i32) {
    %c0_i32 = arith.constant 0 : i32
    %c0_i32_0 = arith.constant 0 : i32
    %c0_i32_1 = arith.constant 0 : i32
    return %c0_i32, %c0_i32_0 : i32, i32
  }
  func.func @transform_2(%arg0: i32) -> (i32, i32) {
    %c0_i32 = arith.constant 0 : i32
    %c0_i32_0 = arith.constant 0 : i32
    %c0_i32_1 = arith.constant 0 : i32
    return %c0_i32, %c0_i32_0 : i32, i32
  }
  func.func @transform_3(%arg0: i32) -> (i32, i32) {
    %c0_i32 = arith.constant 0 : i32
    %c0_i32_0 = arith.constant 0 : i32
    return %arg0, %c0_i32 : i32, i32
  }
}

</mosaic_0001>

<bundles_post_ra>
// kernel: encoder_block_forward.3
= control target key start
LH: loop header
LB: loop body
LE: loop exit
PB: predicated region body
PF: predicated region fallthrough
CT: control target
= control target key end

     0   :  { %s836_s12 = smov 0   ;;  %s1044_s0 = inlined_call_operand.vmem [shape: f32[32,128], index: 0, kind: input, shape index: {}]   ;;  %s1045_s1 = inlined_call_operand.vmem [shape: f32[3,128,128], index: 1, kind: input, shape index: {}]   ;;  %s1046_s2 = inlined_call_operand.vmem [shape: f32[32,128], index: 2, kind: output, shape index: {0}]   ;;  %s1047_s3 = inlined_call_operand.vmem [shape: f32[2,2,128], index: 3, kind: output, shape index: {1}]  }
   0x1 LB: > { %s842_s13 = sadd.s32 4294967295, %s814_s12   ;;  %p599_p0 = scmp.ge.s32.totalorder %s814_s12, 1  ;;  %s814_s12 = sphi %s836_s12, %s14_s12  }
   0x2   : > { %p141_p1 = scmp.lt.s32.totalorder %s814_s12, 3 }
   0x4   : > { %p142_p2 = pnand %p599_p0, %p141_p1 }
   0x5   : > { %s600_s7 = sshll.u32 (!%p142_p2), %s842_s13, 1  ;;  %p181_p4 = scmp.lt.s32.totalorder (!%p142_p2), %s842_s13, 1 }
   0x6   : > { %145 = sbr.rel (%p142_p2) target bundleno = 293 (0x125), region = 28  ;;  %p170_p3 = scmp.lt.s32.totalorder (!%p142_p2), %s600_s7, 3 }
   0xb   : > { %v620_v0 = vld [vmem:[%s1045_s1 + $0xf8] sm:$0xff]  ;;  %v619_v2 = vld [vmem:[%s1045_s1 + $0xf0] sm:$0xff]  ;;  %v618_v4 = vld [vmem:[%s1045_s1 + $0xe8] sm:$0xff]  ;;  %s1049_s7 = smov (!%p170_p3, %s600_s7), 3  ;;  %v187_v22 = vlaneseq  ;;  %s1051_s13 = smov (!%p181_p4, %s842_s13), 1  ;;  %vm505_vm4 = vcmask 1040384  }
   0xc   : > { %v225_v1 = vld [vmem:[%s1045_s1 + $0x78] sm:$0xff]  ;;  %695 = vmatprep.subr.mxu0 %v620_v0  ;;  %v224_v3 = vld [vmem:[%s1045_s1 + $0x70] sm:$0xff]  ;;  %v223_v5 = vld [vmem:[%s1045_s1 + $0x68] sm:$0xff]  ;;  %s601_s30 = sshll.u32 %s1049_s7, 3  ;;  %s604_s7 = sshll.u32 %s1051_s13, 1 }
   0xd   : > { %730 = vmatprep.subr.mxu1 %v225_v1  ;;  %696 = vmatpush3.msra.mxu0 %v620_v0  ;;  %v617_v6 = vld [vmem:[%s1045_s1 + $0xe0] sm:$0xff]  ;;  %v616_v8 = vld [vmem:[%s1045_s1 + $0xd8] sm:$0xff]  ;;  %v615_v10 = vld [vmem:[%s1045_s1 + $0xd0] sm:$0xff]  ;;  %s173_s17 = scalar_lea.vmem %s1044_s0, %s601_s30  ;;  %v933_v27 = vshrl.u32 %v187_v22, 7  ;;  %s179_s22 = scalar_lea.vmem %s1046_s2, %s601_s30 }
   0xe   : > { %731 = vmatpush3.msra.mxu1 %v225_v1  ;;  %697 = vmatprep.subr.mxu0 %v619_v2  ;;  %v222_v7 = vld [vmem:[%s1045_s1 + $0x60] sm:$0xff]  ;;  %v221_v9 = vld [vmem:[%s1045_s1 + $0x58] sm:$0xff]  ;;  %v220_v11 = vld [vmem:[%s1045_s1 + $0x50] sm:$0xff]  ;;  %s184_s24 = scalar_lea.vmem %s1047_s3, %s604_s7 }
   0xf   : > { %732 = vmatprep.subr.mxu1 %v224_v3  ;;  %698 = vmatpush3.msra.mxu0 %v619_v2  ;;  %v614_v12 = vld [vmem:[%s1045_s1 + $0xc8] sm:$0xff]  ;;  %v613_v14 = vld [vmem:[%s1045_s1 + $0xc0] sm:$0xff]  ;;  %v612_v16 = vld [vmem:[%s1045_s1 + $0xb8] sm:$0xff]  ;;  %v190_v35 = vand.u32 15, %v933_v27  ;;  %vm196_vm0 = vcmp.lt.s32.totalorder %v933_v27, 1  ;;  %vm205_vm1 = vcmp.lt.s32.totalorder %v933_v27, 7 }
  0x10   : > { %733 = vmatpush3.msra.mxu1 %v224_v3  ;;  %699 = vmatprep.subr.mxu0 %v618_v4  ;;  %v219_v13 = vld [vmem:[%s1045_s1 + $0x48] sm:$0xff]  ;;  %v218_v15 = vld [vmem:[%s1045_s1 + $0x40] sm:$0xff]  ;;  %v217_v17 = vld [vmem:[%s1045_s1 + $0x38] sm:$0xff]  ;;  %v189_v57 = vadd.s32 8, %v933_v27 }
  0x11   : > { %734 = vmatprep.subr.mxu1 %v223_v5  ;;  %700 = vmatpush3.msra.mxu0 %v618_v4  ;;  %v611_v18 = vld [vmem:[%s1045_s1 + $0xb0] sm:$0xff]  ;;  %v610_v20 = vld [vmem:[%s1045_s1 + $0xa8] sm:$0xff]  ;;  %v609_v23 = vld [vmem:[%s1045_s1 + $0xa0] sm:$0xff]  ;;  %vm192_vm2 = vcmp.ge.s32.totalorder %v190_v35, 1 }
  0x12   : > { %735 = vmatpush3.msra.mxu1 %v223_v5  ;;  %701 = vmatprep.subr.mxu0 %v617_v6  ;;  %v216_v19 = vld [vmem:[%s1045_s1 + $0x30] sm:$0xff]  ;;  %v215_v21 = vld [vmem:[%s1045_s1 + $0x28] sm:$0xff]  ;;  %v214_v24 = vld [vmem:[%s1045_s1 + $0x20] sm:$0xff]  ;;  %v191_v60 = vand.u32 15, %v189_v57 }
  0x13   : > { %736 = vmatprep.subr.mxu1 %v222_v7  ;;  %702 = vmatpush3.msra.mxu0 %v617_v6  ;;  %v608_v25 = vld [vmem:[%s1045_s1 + $0x98] sm:$0xff]  ;;  %v935_v28 = vld [vmem:[%s173_s17] sm:$0xff]  ;;  %v937_v29 = vld [vmem:[%s173_s17 + $0x8] sm:$0xff] }
  0x14   : > { %737 = vmatpush3.msra.mxu1 %v222_v7  ;;  %703 = vmatprep.subr.mxu0 %v616_v8  ;;  %v213_v26 = vld [vmem:[%s1045_s1 + $0x18] sm:$0xff]  ;;  %v607_v30 = vld [vmem:[%s1045_s1 + $0x90] sm:$0xff]  ;;  %v606_v32 = vld [vmem:[%s1045_s1 + $0x88] sm:$0xff]  ;;  %v194_v34 = vrot.slane %v935_v28, 7  ;;  %v195_v36 = vrot.slane %v937_v29, 7  ;;  %v203_v39 = vrot.slane %v935_v28, 1 }
  0x15   : > { %738 = vmatprep.subr.mxu1 %v221_v9  ;;  %704 = vmatpush3.msra.mxu0 %v616_v8  ;;  %v212_v31 = vld [vmem:[%s1045_s1 + $0x10] sm:$0xff]  ;;  %v211_v33 = vld [vmem:[%s1045_s1 + $0x8] sm:$0xff]  ;;  %v605_v37 = vld [vmem:[%s1045_s1 + $0x80] sm:$0xff]  ;;  %v204_v40 = vrot.slane %v937_v29, 1  ;;  %vm202_vm3 = vcmp.le.s32.totalorder %v191_v60, 14 }
  0x16   : > { %739 = vmatpush3.msra.mxu1 %v221_v9  ;;  %705 = vmatprep.subr.mxu0 %v615_v10  ;;  %v210_v38 = vld [vmem:[%s1045_s1] sm:$0xff]  ;;  %v198_v41 = vsel %vm196_vm0, %v195_v36, %v194_v34  ;;  %v197_v42 = vsel %vm196_vm0, %v194_v34, %v195_v36  ;;  %v637_v43 = vld [vmem:[%s1045_s1 + $0x178] sm:$0xff]  ;;  %v636_v45 = vld [vmem:[%s1045_s1 + $0x170] sm:$0xff] }
  0x17   : > { %740 = vmatprep.subr.mxu1 %v220_v11  ;;  %706 = vmatpush3.msra.mxu0 %v615_v10  ;;  %v206_v44 = vsel %vm205_vm1, %v203_v39, %v204_v40  ;;  %v635_v46 = vld [vmem:[%s1045_s1 + $0x168] sm:$0xff]  ;;  %v634_v47 = vld [vmem:[%s1045_s1 + $0x160] sm:$0xff]  ;;  %v633_v48 = vld [vmem:[%s1045_s1 + $0x158] sm:$0xff]  ;;  %v207_v62 = vsel %vm205_vm1, %v204_v40, %v203_v39 }
  0x18   : > { %741 = vmatpush3.msra.mxu1 %v220_v11  ;;  %707 = vmatprep.subr.mxu0 %v614_v12  ;;  %v632_v49 = vld [vmem:[%s1045_s1 + $0x150] sm:$0xff]  ;;  %v631_v50 = vld [vmem:[%s1045_s1 + $0x148] sm:$0xff]  ;;  %v630_v51 = vld [vmem:[%s1045_s1 + $0x140] sm:$0xff] }
  0x19   : > { %742 = vmatprep.subr.mxu1 %v219_v13  ;;  %708 = vmatpush3.msra.mxu0 %v614_v12  ;;  %v629_v52 = vld [vmem:[%s1045_s1 + $0x138] sm:$0xff]  ;;  %v628_v53 = vld [vmem:[%s1045_s1 + $0x130] sm:$0xff]  ;;  %v627_v54 = vld [vmem:[%s1045_s1 + $0x128] sm:$0xff] }
  0x1a   : > { %743 = vmatpush3.msra.mxu1 %v219_v13  ;;  %709 = vmatprep.subr.mxu0 %v613_v14  ;;  %v626_v55 = vld [vmem:[%s1045_s1 + $0x120] sm:$0xff]  ;;  %v625_v56 = vld [vmem:[%s1045_s1 + $0x118] sm:$0xff]  ;;  %v624_v58 = vld [vmem:[%s1045_s1 + $0x110] sm:$0xff] }
  0x1b   : > { %744 = vmatprep.subr.mxu1 %v218_v15  ;;  %710 = vmatpush3.msra.mxu0 %v613_v14  ;;  %v623_v59 = vld [vmem:[%s1045_s1 + $0x108] sm:$0xff]  ;;  %v622_v61 = vld [vmem:[%s1045_s1 + $0x100] sm:$0xff] }
  0x1c   : > { %745 = vmatpush3.msra.mxu1 %v218_v15  ;;  %711 = vmatprep.subr.mxu0 %v612_v16 }
  0x1d   : > { %746 = vmatprep.subr.mxu1 %v217_v17  ;;  %712 = vmatpush3.msra.mxu0 %v612_v16 }
  0x1e   : > { %747 = vmatpush3.msra.mxu1 %v217_v17  ;;  %713 = vmatprep.subr.mxu0 %v611_v18 }
  0x1f   : > { %748 = vmatprep.subr.mxu1 %v216_v19  ;;  %714 = vmatpush3.msra.mxu0 %v611_v18 }
  0x20   : > { %749 = vmatpush3.msra.mxu1 %v216_v19  ;;  %715 = vmatprep.subr.mxu0 %v610_v20 }
  0x21   : > { %750 = vmatprep.subr.mxu1 %v215_v21  ;;  %716 = vmatpush3.msra.mxu0 %v610_v20 }
  0x22   : > { %751 = vmatpush3.msra.mxu1 %v215_v21  ;;  %717 = vmatprep.subr.mxu0 %v609_v23 }
  0x23   : > { %752 = vmatprep.subr.mxu1 %v214_v24  ;;  %718 = vmatpush3.msra.mxu0 %v609_v23 }
  0x24   : > { %753 = vmatpush3.msra.mxu1 %v214_v24  ;;  %719 = vmatprep.subr.mxu0 %v608_v25 }
  0x25   : > { %754 = vmatprep.subr.mxu1 %v213_v26  ;;  %720 = vmatpush3.msra.mxu0 %v608_v25 }
  0x26   : > { %755 = vmatpush3.msra.mxu1 %v213_v26  ;;  %721 = vmatprep.subr.mxu0 %v607_v30 }
  0x27   : > { %756 = vmatprep.subr.mxu1 %v212_v31  ;;  %722 = vmatpush3.msra.mxu0 %v607_v30 }
  0x28   : > { %757 = vmatpush3.msra.mxu1 %v212_v31  ;;  %723 = vmatprep.subr.mxu0 %v606_v32 }
  0x29   : > { %758 = vmatprep.subr.mxu1 %v211_v33  ;;  %724 = vmatpush3.msra.mxu0 %v606_v32 }
  0x2a   : > { %759 = vmatpush3.msra.mxu1 %v211_v33  ;;  %725 = vmatprep.subr.mxu0 %v605_v37 }
  0x2b   : > { %760 = vmatprep.subr.mxu1 %v210_v38  ;;  %726 = vmatpush3.msra.mxu0 %v605_v37 }
  0x2c   : > { %727 = vmatprep.mubr.f32.mxu0 %v935_v28  ;;  %761 = vmatpush3.msra.mxu1 %v210_v38 }
  0x2d   : > { %762 = vmatprep.mubr.msk.f32.mxu1 %vm192_vm2, %v198_v41  ;;  %728 = vmatmul.mubr.f32.vlgmr.msra.gmra.mxu0 %v937_v29 }
  0x2e   : > { %763 = vmatmul.mubr.f32.vlgmr.msra.gmra.mxu1 %v197_v42  ;;  %765 = vmatprep.subr.mxu0 %v637_v43 }
  0x2f   : > { %797 = vmatprep.mubr.f32.mxu0 %v206_v44  ;;  %766 = vmatpush3.msra.mxu0 %v637_v43 }
  0x30   : > { %767 = vmatprep.subr.mxu0 %v636_v45 }
  0x31   : > { %768 = vmatpush3.msra.mxu0 %v636_v45 }
  0x32   : > { %769 = vmatprep.subr.mxu0 %v635_v46 }
  0x33   : > { %770 = vmatpush3.msra.mxu0 %v635_v46 }
  0x34   : > { %771 = vmatprep.subr.mxu0 %v634_v47 }
  0x35   : > { %772 = vmatpush3.msra.mxu0 %v634_v47 }
  0x36   : > { %773 = vmatprep.subr.mxu0 %v633_v48 }
  0x37   : > { %774 = vmatpush3.msra.mxu0 %v633_v48 }
  0x38   : > { %775 = vmatprep.subr.mxu0 %v632_v49 }
  0x39   : > { %776 = vmatpush3.msra.mxu0 %v632_v49 }
  0x3a   : > { %777 = vmatprep.subr.mxu0 %v631_v50 }
  0x3b   : > { %778 = vmatpush3.msra.mxu0 %v631_v50 }
  0x3c   : > { %779 = vmatprep.subr.mxu0 %v630_v51 }
  0x3d   : > { %780 = vmatpush3.msra.mxu0 %v630_v51 }
  0x3e   : > { %781 = vmatprep.subr.mxu0 %v629_v52 }
  0x3f   : > { %782 = vmatpush3.msra.mxu0 %v629_v52 }
  0x40   : > { %783 = vmatprep.subr.mxu0 %v628_v53 }
  0x41   : > { %784 = vmatpush3.msra.mxu0 %v628_v53 }
  0x42   : > { %785 = vmatprep.subr.mxu0 %v627_v54 }
  0x43   : > { %786 = vmatpush3.msra.mxu0 %v627_v54 }
  0x44   : > { %787 = vmatprep.subr.mxu0 %v626_v55 }
  0x45   : > { %788 = vmatpush3.msra.mxu0 %v626_v55 }
  0x46   : > { %789 = vmatprep.subr.mxu0 %v625_v56 }
  0x47   : > { %790 = vmatpush3.msra.mxu0 %v625_v56 }
  0x48   : > { %791 = vmatprep.subr.mxu0 %v624_v58 }
  0x49   : > { %792 = vmatpush3.msra.mxu0 %v624_v58 }
  0x4a   : > { %793 = vmatprep.subr.mxu0 %v623_v59 }
  0x4b   : > { %794 = vmatpush3.msra.mxu0 %v623_v59 }
  0x4c   : > { %795 = vmatprep.subr.mxu0 %v622_v61 }
  0x4d   : > { %796 = vmatpush3.msra.mxu0 %v622_v61 }
  0x4e   : > { %798 = vmatmul.mubr.msk.f32.vlgmr.msra.gmra.mxu0 %vm202_vm3, %v207_v62 }
  0xed   : > { %v729_v63 = vpop.f32.mrf.mxu0 }
  0xee   : > { %v764_v0 = vpop.f32.mrf.mxu1 }
  0xef   : > { %v309_v1 = vpop.f32.mrf.mxu0  ;;  %v390_v3 = vadd.f32 %v764_v0, %v729_v63 }
  0xf0   : > { %v384_v2 = vpop.f32.mrf.mxu1 }
  0xf1   : > { %v385_v5 = vadd.f32 %v384_v2, %v309_v1 }
 0x10e   : > { %v799_v4 = vpop.f32.mrf.mxu0 }
 0x10f   : > { %v486_v6 = vadd.f32 %v799_v4, %v390_v3 }
 0x110   : > { %v476_v7 = vpop.f32.mrf.mxu0 }
 0x111   : > { %v485_v8 = vadd.f32 %v476_v7, %v385_v5  ;;  %v497_v9 = vmul.f32 %v486_v6, %v486_v6  ;;  %488 = vst [vmem:[%s179_s22 + $0x8] sm:$0xff] %v486_v6 }
 0x113   : > { %487 = vst [vmem:[%s179_s22] sm:$0xff] %v485_v8  ;;  %v489_v10 = vadd.f32 %v486_v6, %v485_v8  ;;  %v496_v11 = vmul.f32 %v485_v8, %v485_v8 }
 0x115   : > { %v490_v12 = vrot.slane %v489_v10, 4  ;;  %v498_v13 = vadd.f32 %v497_v9, %v496_v11 }
 0x117   : > { %v491_v14 = vadd.f32 %v490_v12, %v489_v10  ;;  %v499_v15 = vrot.slane %v498_v13, 4 }
 0x119   : > { %v492_v16 = vrot.slane %v491_v14, 2  ;;  %v500_v17 = vadd.f32 %v499_v15, %v498_v13 }
 0x11b   : > { %v493_v18 = vadd.f32 %v492_v16, %v491_v14  ;;  %v501_v19 = vrot.slane %v500_v17, 2 }
 0x11d   : > { %v494_v20 = vrot.slane %v493_v18, 1  ;;  %v502_v21 = vadd.f32 %v501_v19, %v500_v17 }
 0x11f   : > { %v503_v22 = vrot.slane %v502_v21, 1  ;;  %v495_v23 = vadd.f32 %v494_v20, %v493_v18 }
 0x121   : > { %v504_v24 = vadd.f32 %v503_v22, %v502_v21 }
 0x123   : > { %v506_v25 = vsel %vm505_vm4, %v495_v23, %v504_v24 }
 0x124   : > { %507 = vst [vmem:[%s184_s24] sm:$0x3] %v506_v25 }
 0x125 PF: > { %s14_s12 = sadd.s32 1, %s814_s12  }
 0x126   : > { %p11_p5 = scmp.ge.s32.totalorder %s14_s12, 4  }
 0x128   :  { %13 = sbr.rel (!%p11_p5) target bundleno = 1 (0x1), region = 72 }

// kernel: tile.23
= control target key start
LH: loop header
LB: loop body
LE: loop exit
PB: predicated region body
PF: predicated region fallthrough
CT: control target
= control target key end

     0   :  { %s28_s0 = inlined_call_operand.vmem [shape: f32[8], index: 0, kind: input, shape index: {}]   ;;  %s29_s1 = inlined_call_operand.vmem [shape: f32[16,8], index: 1, kind: output, shape index: {}]  }
   0x1   :  { %v4_v0 = vld [vmem:[%s28_s0] ss:$0 sm:$0xff] }
   0x2   :  { %5 = vst [vmem:[%s29_s1] sm:$0xff] %v4_v0  ;;  %8 = vst [vmem:[%s29_s1 + $0x8] sm:$0xff] %v4_v0 }

// kernel: tile.24
= control target key start
LH: loop header
LB: loop body
LE: loop exit
PB: predicated region body
PF: predicated region fallthrough
CT: control target
= control target key end

     0   :  { %s133_s10 = smov 120   ;;  %s134_s11 = smov 104   ;;  %vm3_vm0 = vcmask 64512   ;;  %vm9_vm1 = vcmask 1048512   ;;  %vm15_vm2 = vcmask 982912   ;;  %vm21_vm3 = vcmask 917312   ;;  %s209_s0 = inlined_call_operand.vmem [shape: f32[16,8], index: 0, kind: input, shape index: {}]   ;;  %s210_s1 = inlined_call_operand.vmem [shape: f32[1,128], index: 1, kind: output, shape index: {}]  }
   0x1   :  { %v103_v0 = vld [vmem:[%s209_s0 + $0xf] sm:$0x1]   ;;  %v105_v1 = vld [vmem:[%s209_s0 + $0xd] sm:$0x1]   ;;  %v104_v2 = vld [vmem:[%s209_s0 + $0xe] sm:$0x1]  }
   0x2   :  { %7 = vrot.lane.b32.xlu0 %v103_v0, %s133_s10  ;;  %19 = vrot.lane.b32.xlu1 %v105_v1, %s134_s11  ;;  %v106_v3 = vld [vmem:[%s209_s0 + $0xc] sm:$0x1]   ;;  %s135_s16 = smov 112   ;;  %s136_s17 = smov 96   ;;  %v107_v4 = vld [vmem:[%s209_s0 + $0xb] sm:$0x1]  }
   0x3   :  { %v108_v5 = vld [vmem:[%s209_s0 + $0xa] sm:$0x1]   ;;  %v2_v6 = vld [vmem:[%s209_s0] sm:$0x1]   ;;  %s137_s24 = smov 88   ;;  %s138_s25 = smov 80  }
   0x4   :  { %4 = vst.msk [vmem:[#allocation0] sm:$0x1] %vm3_vm0, %v2_v6   ;;  %v109_v7 = vld [vmem:[%s209_s0 + $0x9] sm:$0x1]   ;;  %v110_v8 = vld [vmem:[%s209_s0 + $0x8] sm:$0x1]  }
   0x5   :  { %s139_s30 = smov 72   ;;  %s140_s2 = smov 64   ;;  %v111_v9 = vld [vmem:[%s209_s0 + $0x7] sm:$0x1]   ;;  %v112_v10 = vld [vmem:[%s209_s0 + $0x6] sm:$0x1]  }
   0x6   :  { %13 = vrot.lane.b32.xlu0 %v104_v2, %s135_s16  ;;  %25 = vrot.lane.b32.xlu1 %v106_v3, %s136_s17  ;;  %s141_s7 = smov 56   ;;  %s142_s8 = smov 48   ;;  %v113_v11 = vld [vmem:[%s209_s0 + $0x5] sm:$0x1]   ;;  %v114_v12 = vld [vmem:[%s209_s0 + $0x4] sm:$0x1]  }
   0x7   :  { %s143_s13 = smov 40   ;;  %s144_s14 = smov 32   ;;  %v115_v13 = vld [vmem:[%s209_s0 + $0x3] sm:$0x1]   ;;  %v116_v14 = vld [vmem:[%s209_s0 + $0x2] sm:$0x1]  }
   0x8   :  { %s145_s19 = smov 24   ;;  %s146_s20 = smov 16   ;;  %v117_v15 = vld [vmem:[%s209_s0 + $0x1] sm:$0x1]   ;;  %vm27_vm4 = vcmask 851712   ;;  %vm33_vm5 = vcmask 786112  }
   0x9   :  { %s147_s0 = smov 8   ;;  %vm39_vm6 = vcmask 720512   ;;  %vm45_vm7 = vcmask 654912   ;;  %vm51_vm8 = vcmask 589312   ;;  %vm57_vm9 = vcmask 523712  }
   0xa   :  { %31 = vrot.lane.b32.xlu0 %v107_v4, %s137_s24  ;;  %37 = vrot.lane.b32.xlu1 %v108_v5, %s138_s25  ;;  %vm63_vm10 = vcmask 458112   ;;  %vm69_vm11 = vcmask 392512   ;;  %vm75_vm12 = vcmask 326912   ;;  %vm81_vm13 = vcmask 261312  }
   0xb   :  { %vm87_vm14 = vcmask 195712   ;;  %vm93_vm15 = vcmask 130112  }
   0xe   :  { %43 = vrot.lane.b32.xlu0 %v109_v7, %s139_s30  ;;  %49 = vrot.lane.b32.xlu1 %v110_v8, %s140_s2 }
  0x12   :  { %55 = vrot.lane.b32.xlu0 %v111_v9, %s141_s7  ;;  %61 = vrot.lane.b32.xlu1 %v112_v10, %s142_s8 }
  0x16   :  { %67 = vrot.lane.b32.xlu0 %v113_v11, %s143_s13  ;;  %73 = vrot.lane.b32.xlu1 %v114_v12, %s144_s14 }
  0x1a   :  { %79 = vrot.lane.b32.xlu0 %v115_v13, %s145_s19  ;;  %85 = vrot.lane.b32.xlu1 %v116_v14, %s146_s20 }
  0x1e   :  { %91 = vrot.lane.b32.xlu0 %v117_v15, %s147_s0 }
  0x74   :  { %v8_v16 = vpop.permute.xlu0 %7   ;;  %v20_v17 = vpop.permute.xlu1 %19  }
  0x75   :  { %10 = vst.msk [vmem:[#allocation0] sm:$0x1] %vm9_vm1, %v8_v16  }
  0x78   :  { %v14_v18 = vpop.permute.xlu0 %13   ;;  %v26_v19 = vpop.permute.xlu1 %25  }
  0x79   :  { %16 = vst.msk [vmem:[#allocation0] sm:$0x1] %vm15_vm2, %v14_v18  }
  0x7a   :  { %22 = vst.msk [vmem:[#allocation0] sm:$0x1] %vm21_vm3, %v20_v17  }
  0x7b   :  { %28 = vst.msk [vmem:[#allocation0] sm:$0x1] %vm27_vm4, %v26_v19  }
  0x7c   :  { %v32_v20 = vpop.permute.xlu0 %31   ;;  %v38_v21 = vpop.permute.xlu1 %37  }
  0x7d   :  { %34 = vst.msk [vmem:[#allocation0] sm:$0x1] %vm33_vm5, %v32_v20  }
  0x7e   :  { %40 = vst.msk [vmem:[#allocation0] sm:$0x1] %vm39_vm6, %v38_v21  }
  0x80   :  { %v44_v22 = vpop.permute.xlu0 %43   ;;  %v50_v23 = vpop.permute.xlu1 %49  }
  0x81   :  { %46 = vst.msk [vmem:[#allocation0] sm:$0x1] %vm45_vm7, %v44_v22  }
  0x82   :  { %52 = vst.msk [vmem:[#allocation0] sm:$0x1] %vm51_vm8, %v50_v23  }
  0x84   :  { %v56_v24 = vpop.permute.xlu0 %55   ;;  %v62_v25 = vpop.permute.xlu1 %61  }
  0x85   :  { %58 = vst.msk [vmem:[#allocation0] sm:$0x1] %vm57_vm9, %v56_v24  }
  0x86   :  { %64 = vst.msk [vmem:[#allocation0] sm:$0x1] %vm63_vm10, %v62_v25  }
  0x88   :  { %v68_v26 = vpop.permute.xlu0 %67   ;;  %v74_v27 = vpop.permute.xlu1 %73  }
  0x89   :  { %70 = vst.msk [vmem:[#allocation0] sm:$0x1] %vm69_vm11, %v68_v26  }
  0x8a   :  { %76 = vst.msk [vmem:[#allocation0] sm:$0x1] %vm75_vm12, %v74_v27  }
  0x8c   :  { %v80_v28 = vpop.permute.xlu0 %79   ;;  %v86_v29 = vpop.permute.xlu1 %85  }
  0x8d   :  { %82 = vst.msk [vmem:[#allocation0] sm:$0x1] %vm81_vm13, %v80_v28  }
  0x8e   :  { %88 = vst.msk [vmem:[#allocation0] sm:$0x1] %vm87_vm14, %v86_v29  }
  0x90   :  { %v92_v30 = vpop.permute.xlu0 %91  }
  0x91   :  { %94 = vst.msk [vmem:[#allocation0] sm:$0x1] %vm93_vm15, %v92_v30  }
  0x98   :  { %v99_v31 = vld [vmem:[#allocation0] sm:$0x1] }
  0x99   :  { %102 = vst [vmem:[%s210_s1] sm:$0x1] %v99_v31 }

// kernel: encoder_block_forward.5
= control target key start
LH: loop header
LB: loop body
LE: loop exit
PB: predicated region body
PF: predicated region fallthrough
CT: control target
= control target key end

     0   :  { %s104_s0 = inlined_call_operand.vmem [shape: f32[32,128], index: 0, kind: input, shape index: {}]   ;;  %s105_s1 = inlined_call_operand.vmem [shape: f32[1,128], index: 1, kind: input, shape index: {}]   ;;  %s106_s2 = inlined_call_operand.vmem [shape: f32[1,128], index: 2, kind: input, shape index: {}]   ;;  %s107_s3 = inlined_call_operand.vmem [shape: f32[32,128], index: 3, kind: output, shape index: {}]  }
   0x1   :  { %v14_v0 = vld [vmem:[%s104_s0] sm:$0xff]  ;;  %v15_v4 = vld [vmem:[%s104_s0 + $0x8] sm:$0xff]  ;;  %v16_v5 = vld [vmem:[%s104_s0 + $0x10] sm:$0xff] }
   0x2   :  { %v52_v1 = vld [vmem:[%s105_s1] ss:$0 sm:$0xff]  ;;  %v17_v6 = vld [vmem:[%s104_s0 + $0x18] sm:$0xff] }
   0x3   :  { %v53_v2 = vld [vmem:[%s106_s2] ss:$0 sm:$0xff]  ;;  %v25_v3 = vmul.f32 %v52_v1, %v14_v0  ;;  %v26_v7 = vmul.f32 %v52_v1, %v15_v4  ;;  %v27_v8 = vmul.f32 %v52_v1, %v16_v5  ;;  %v28_v9 = vmul.f32 %v52_v1, %v17_v6 }
   0x5   :  { %v36_v10 = vadd.f32 %v53_v2, %v25_v3  ;;  %v37_v11 = vadd.f32 %v53_v2, %v26_v7  ;;  %v38_v12 = vadd.f32 %v53_v2, %v27_v8  ;;  %v39_v13 = vadd.f32 %v53_v2, %v28_v9 }
   0x7   :  { %v40_v14 = vmax.f32 %v36_v10, 0.0  ;;  %v41_v15 = vmax.f32 %v37_v11, 0.0  ;;  %v42_v16 = vmax.f32 %v38_v12, 0.0  ;;  %v43_v17 = vmax.f32 %v39_v13, 0.0 }
   0x9   :  { %44 = vst [vmem:[%s107_s3] sm:$0xff] %v40_v14  ;;  %45 = vst [vmem:[%s107_s3 + $0x8] sm:$0xff] %v41_v15 }
   0xa   :  { %46 = vst [vmem:[%s107_s3 + $0x10] sm:$0xff] %v42_v16  ;;  %47 = vst [vmem:[%s107_s3 + $0x18] sm:$0xff] %v43_v17 }

// kernel: encoder_block_forward.4
= control target key start
LH: loop header
LB: loop body
LE: loop exit
PB: predicated region body
PF: predicated region fallthrough
CT: control target
= control target key end

     0   :  { %s922_s18 = smov 0   ;;  %s1136_s0 = inlined_call_operand.vmem [shape: f32[32,128], index: 0, kind: input, shape index: {}]   ;;  %s1137_s1 = inlined_call_operand.vmem [shape: f32[1,128], index: 1, kind: input, shape index: {}]   ;;  %s1138_s2 = inlined_call_operand.vmem [shape: f32[1,128], index: 2, kind: input, shape index: {}]   ;;  %s1139_s3 = inlined_call_operand.vmem [shape: f32[3,128,128], index: 3, kind: input, shape index: {}]   ;;  %s1140_s4 = inlined_call_operand.vmem [shape: f32[32,128], index: 4, kind: output, shape index: {0}]   ;;  %s1141_s5 = inlined_call_operand.vmem [shape: f32[2,2,128], index: 5, kind: output, shape index: {1}]  }
   0x1 LB: > { %s928_s19 = sadd.s32 4294967295, %s890_s18   ;;  %p673_p0 = scmp.ge.s32.totalorder %s890_s18, 1  ;;  %s890_s18 = sphi %s922_s18, %s16_s18  }
   0x2   : > { %p191_p1 = scmp.lt.s32.totalorder %s890_s18, 3 }
   0x4   : > { %p192_p2 = pnand %p673_p0, %p191_p1 }
   0x5   : > { %s674_s26 = sshll.u32 (!%p192_p2), %s928_s19, 1  ;;  %p235_p4 = scmp.lt.s32.totalorder (!%p192_p2), %s928_s19, 1 }
   0x6   : > { %195 = sbr.rel (%p192_p2) target bundleno = 293 (0x125), region = 36  ;;  %p224_p3 = scmp.lt.s32.totalorder (!%p192_p2), %s674_s26, 3 }
   0xb   : > { %v696_v0 = vld [vmem:[%s1139_s3 + $0xf8] sm:$0xff]  ;;  %v695_v2 = vld [vmem:[%s1139_s3 + $0xf0] sm:$0xff]  ;;  %v694_v4 = vld [vmem:[%s1139_s3 + $0xe8] sm:$0xff]  ;;  %s1143_s26 = smov (!%p224_p3, %s674_s26), 3  ;;  %v261_v30 = vlaneseq  ;;  %s1145_s19 = smov (!%p235_p4, %s928_s19), 1  ;;  %vm579_vm4 = vcmask 1040384  }
   0xc   : > { %v299_v1 = vld [vmem:[%s1139_s3 + $0x78] sm:$0xff]  ;;  %771 = vmatprep.subr.mxu0 %v696_v0  ;;  %v298_v3 = vld [vmem:[%s1139_s3 + $0x70] sm:$0xff]  ;;  %v297_v5 = vld [vmem:[%s1139_s3 + $0x68] sm:$0xff]  ;;  %s675_s12 = sshll.u32 %s1143_s26, 3  ;;  %s678_s26 = sshll.u32 %s1145_s19, 1 }
   0xd   : > { %806 = vmatprep.subr.mxu1 %v299_v1  ;;  %772 = vmatpush3.msra.mxu0 %v696_v0  ;;  %v693_v6 = vld [vmem:[%s1139_s3 + $0xe0] sm:$0xff]  ;;  %v692_v8 = vld [vmem:[%s1139_s3 + $0xd8] sm:$0xff]  ;;  %v691_v10 = vld [vmem:[%s1139_s3 + $0xd0] sm:$0xff]  ;;  %s227_s25 = scalar_lea.vmem %s1136_s0, %s675_s12  ;;  %v1029_v37 = vshrl.u32 %v261_v30, 7  ;;  %s233_s20 = scalar_lea.vmem %s1140_s4, %s675_s12 }
   0xe   : > { %807 = vmatpush3.msra.mxu1 %v299_v1  ;;  %773 = vmatprep.subr.mxu0 %v695_v2  ;;  %v296_v7 = vld [vmem:[%s1139_s3 + $0x60] sm:$0xff]  ;;  %v295_v9 = vld [vmem:[%s1139_s3 + $0x58] sm:$0xff]  ;;  %v294_v11 = vld [vmem:[%s1139_s3 + $0x50] sm:$0xff]  ;;  %s238_s22 = scalar_lea.vmem %s1141_s5, %s678_s26 }
   0xf   : > { %808 = vmatprep.subr.mxu1 %v298_v3  ;;  %774 = vmatpush3.msra.mxu0 %v695_v2  ;;  %v690_v12 = vld [vmem:[%s1139_s3 + $0xc8] sm:$0xff]  ;;  %v239_v14 = vld [vmem:[%s227_s25] sm:$0xff]  ;;  %v688_v19 = vld [vmem:[%s1139_s3 + $0xb8] sm:$0xff]  ;;  %v264_v42 = vand.u32 15, %v1029_v37  ;;  %vm270_vm0 = vcmp.lt.s32.totalorder %v1029_v37, 1  ;;  %vm279_vm1 = vcmp.lt.s32.totalorder %v1029_v37, 7 }
  0x10   : > { %809 = vmatpush3.msra.mxu1 %v298_v3  ;;  %775 = vmatprep.subr.mxu0 %v694_v4  ;;  %v293_v13 = vld [vmem:[%s1139_s3 + $0x48] sm:$0xff]  ;;  %v679_v16 = vld [vmem:[%s1137_s1] ss:$0 sm:$0xff]  ;;  %v291_v20 = vld [vmem:[%s1139_s3 + $0x38] sm:$0xff]  ;;  %v263_v1 = vadd.s32 8, %v1029_v37 }
  0x11   : > { %810 = vmatprep.subr.mxu1 %v297_v5  ;;  %776 = vmatpush3.msra.mxu0 %v694_v4  ;;  %v240_v15 = vld [vmem:[%s227_s25 + $0x8] sm:$0xff]  ;;  %v689_v17 = vld [vmem:[%s1139_s3 + $0xc0] sm:$0xff]  ;;  %v248_v21 = vmul.f32 %v679_v16, %v239_v14  ;;  %v687_v24 = vld [vmem:[%s1139_s3 + $0xb0] sm:$0xff]  ;;  %vm266_vm2 = vcmp.ge.s32.totalorder %v264_v42, 1 }
  0x12   : > { %811 = vmatpush3.msra.mxu1 %v297_v5  ;;  %777 = vmatprep.subr.mxu0 %v693_v6  ;;  %v292_v18 = vld [vmem:[%s1139_s3 + $0x40] sm:$0xff]  ;;  %v249_v22 = vmul.f32 %v679_v16, %v240_v15  ;;  %v290_v25 = vld [vmem:[%s1139_s3 + $0x30] sm:$0xff]  ;;  %v686_v26 = vld [vmem:[%s1139_s3 + $0xa8] sm:$0xff]  ;;  %v265_v4 = vand.u32 15, %v263_v1 }
  0x13   : > { %812 = vmatprep.subr.mxu1 %v296_v7  ;;  %778 = vmatpush3.msra.mxu0 %v693_v6  ;;  %v680_v23 = vld [vmem:[%s1138_s2] ss:$0 sm:$0xff]  ;;  %v289_v27 = vld [vmem:[%s1139_s3 + $0x28] sm:$0xff]  ;;  %v684_v33 = vld [vmem:[%s1139_s3 + $0x98] sm:$0xff] }
  0x14   : > { %813 = vmatpush3.msra.mxu1 %v296_v7  ;;  %779 = vmatprep.subr.mxu0 %v692_v8  ;;  %v257_v28 = vadd.f32 %v680_v23, %v248_v21  ;;  %v258_v29 = vadd.f32 %v680_v23, %v249_v22  ;;  %v685_v31 = vld [vmem:[%s1139_s3 + $0xa0] sm:$0xff]  ;;  %v287_v34 = vld [vmem:[%s1139_s3 + $0x18] sm:$0xff]  ;;  %v683_v38 = vld [vmem:[%s1139_s3 + $0x90] sm:$0xff]  ;;  %vm276_vm3 = vcmp.le.s32.totalorder %v265_v4, 14 }
  0x15   : > { %814 = vmatprep.subr.mxu1 %v295_v9  ;;  %780 = vmatpush3.msra.mxu0 %v692_v8  ;;  %v288_v32 = vld [vmem:[%s1139_s3 + $0x20] sm:$0xff]  ;;  %v286_v39 = vld [vmem:[%s1139_s3 + $0x10] sm:$0xff]  ;;  %v682_v40 = vld [vmem:[%s1139_s3 + $0x88] sm:$0xff] }
  0x16   : > { %815 = vmatpush3.msra.mxu1 %v295_v9  ;;  %781 = vmatprep.subr.mxu0 %v691_v10  ;;  %v1025_v35 = vmax.f32 %v257_v28, 0.0  ;;  %v1027_v36 = vmax.f32 %v258_v29, 0.0  ;;  %v285_v41 = vld [vmem:[%s1139_s3 + $0x8] sm:$0xff]  ;;  %v681_v45 = vld [vmem:[%s1139_s3 + $0x80] sm:$0xff]  ;;  %v713_v51 = vld [vmem:[%s1139_s3 + $0x178] sm:$0xff] }
  0x17   : > { %816 = vmatprep.subr.mxu1 %v294_v11  ;;  %782 = vmatpush3.msra.mxu0 %v691_v10  ;;  %v284_v46 = vld [vmem:[%s1139_s3] sm:$0xff]  ;;  %v712_v53 = vld [vmem:[%s1139_s3 + $0x170] sm:$0xff]  ;;  %v711_v54 = vld [vmem:[%s1139_s3 + $0x168] sm:$0xff] }
  0x18   : > { %817 = vmatpush3.msra.mxu1 %v294_v11  ;;  %783 = vmatprep.subr.mxu0 %v690_v12  ;;  %v268_v43 = vrot.slane %v1025_v35, 7  ;;  %v269_v44 = vrot.slane %v1027_v36, 7  ;;  %v277_v47 = vrot.slane %v1025_v35, 1  ;;  %v278_v48 = vrot.slane %v1027_v36, 1  ;;  %v710_v55 = vld [vmem:[%s1139_s3 + $0x160] sm:$0xff]  ;;  %v709_v56 = vld [vmem:[%s1139_s3 + $0x158] sm:$0xff] }
  0x19   : > { %818 = vmatprep.subr.mxu1 %v293_v13  ;;  %784 = vmatpush3.msra.mxu0 %v690_v12  ;;  %v708_v57 = vld [vmem:[%s1139_s3 + $0x150] sm:$0xff]  ;;  %v707_v58 = vld [vmem:[%s1139_s3 + $0x148] sm:$0xff]  ;;  %v706_v59 = vld [vmem:[%s1139_s3 + $0x140] sm:$0xff] }
  0x1a   : > { %819 = vmatpush3.msra.mxu1 %v293_v13  ;;  %785 = vmatprep.subr.mxu0 %v689_v17  ;;  %v272_v49 = vsel %vm270_vm0, %v269_v44, %v268_v43  ;;  %v271_v50 = vsel %vm270_vm0, %v268_v43, %v269_v44  ;;  %v280_v52 = vsel %vm279_vm1, %v277_v47, %v278_v48  ;;  %v705_v60 = vld [vmem:[%s1139_s3 + $0x138] sm:$0xff]  ;;  %v704_v61 = vld [vmem:[%s1139_s3 + $0x130] sm:$0xff]  ;;  %v703_v62 = vld [vmem:[%s1139_s3 + $0x128] sm:$0xff] }
  0x1b   : > { %820 = vmatprep.subr.mxu1 %v292_v18  ;;  %786 = vmatpush3.msra.mxu0 %v689_v17  ;;  %v702_v63 = vld [vmem:[%s1139_s3 + $0x120] sm:$0xff]  ;;  %v701_v0 = vld [vmem:[%s1139_s3 + $0x118] sm:$0xff]  ;;  %v700_v2 = vld [vmem:[%s1139_s3 + $0x110] sm:$0xff]  ;;  %v281_v6 = vsel %vm279_vm1, %v278_v48, %v277_v47 }
  0x1c   : > { %821 = vmatpush3.msra.mxu1 %v292_v18  ;;  %787 = vmatprep.subr.mxu0 %v688_v19  ;;  %v699_v3 = vld [vmem:[%s1139_s3 + $0x108] sm:$0xff]  ;;  %v698_v5 = vld [vmem:[%s1139_s3 + $0x100] sm:$0xff] }
  0x1d   : > { %822 = vmatprep.subr.mxu1 %v291_v20  ;;  %788 = vmatpush3.msra.mxu0 %v688_v19 }
  0x1e   : > { %823 = vmatpush3.msra.mxu1 %v291_v20  ;;  %789 = vmatprep.subr.mxu0 %v687_v24 }
  0x1f   : > { %824 = vmatprep.subr.mxu1 %v290_v25  ;;  %790 = vmatpush3.msra.mxu0 %v687_v24 }
  0x20   : > { %825 = vmatpush3.msra.mxu1 %v290_v25  ;;  %791 = vmatprep.subr.mxu0 %v686_v26 }
  0x21   : > { %826 = vmatprep.subr.mxu1 %v289_v27  ;;  %792 = vmatpush3.msra.mxu0 %v686_v26 }
  0x22   : > { %827 = vmatpush3.msra.mxu1 %v289_v27  ;;  %793 = vmatprep.subr.mxu0 %v685_v31 }
  0x23   : > { %828 = vmatprep.subr.mxu1 %v288_v32  ;;  %794 = vmatpush3.msra.mxu0 %v685_v31 }
  0x24   : > { %829 = vmatpush3.msra.mxu1 %v288_v32  ;;  %795 = vmatprep.subr.mxu0 %v684_v33 }
  0x25   : > { %830 = vmatprep.subr.mxu1 %v287_v34  ;;  %796 = vmatpush3.msra.mxu0 %v684_v33 }
  0x26   : > { %831 = vmatpush3.msra.mxu1 %v287_v34  ;;  %797 = vmatprep.subr.mxu0 %v683_v38 }
  0x27   : > { %832 = vmatprep.subr.mxu1 %v286_v39  ;;  %798 = vmatpush3.msra.mxu0 %v683_v38 }
  0x28   : > { %833 = vmatpush3.msra.mxu1 %v286_v39  ;;  %799 = vmatprep.subr.mxu0 %v682_v40 }
  0x29   : > { %834 = vmatprep.subr.mxu1 %v285_v41  ;;  %800 = vmatpush3.msra.mxu0 %v682_v40 }
  0x2a   : > { %835 = vmatpush3.msra.mxu1 %v285_v41  ;;  %801 = vmatprep.subr.mxu0 %v681_v45 }
  0x2b   : > { %836 = vmatprep.subr.mxu1 %v284_v46  ;;  %802 = vmatpush3.msra.mxu0 %v681_v45 }
  0x2c   : > { %803 = vmatprep.mubr.f32.mxu0 %v1025_v35  ;;  %837 = vmatpush3.msra.mxu1 %v284_v46 }
  0x2d   : > { %838 = vmatprep.mubr.msk.f32.mxu1 %vm266_vm2, %v272_v49  ;;  %804 = vmatmul.mubr.f32.vlgmr.msra.gmra.mxu0 %v1027_v36 }
  0x2e   : > { %839 = vmatmul.mubr.f32.vlgmr.msra.gmra.mxu1 %v271_v50  ;;  %841 = vmatprep.subr.mxu0 %v713_v51 }
  0x2f   : > { %873 = vmatprep.mubr.f32.mxu0 %v280_v52  ;;  %842 = vmatpush3.msra.mxu0 %v713_v51 }
  0x30   : > { %843 = vmatprep.subr.mxu0 %v712_v53 }
  0x31   : > { %844 = vmatpush3.msra.mxu0 %v712_v53 }
  0x32   : > { %845 = vmatprep.subr.mxu0 %v711_v54 }
  0x33   : > { %846 = vmatpush3.msra.mxu0 %v711_v54 }
  0x34   : > { %847 = vmatprep.subr.mxu0 %v710_v55 }
  0x35   : > { %848 = vmatpush3.msra.mxu0 %v710_v55 }
  0x36   : > { %849 = vmatprep.subr.mxu0 %v709_v56 }
  0x37   : > { %850 = vmatpush3.msra.mxu0 %v709_v56 }
  0x38   : > { %851 = vmatprep.subr.mxu0 %v708_v57 }
  0x39   : > { %852 = vmatpush3.msra.mxu0 %v708_v57 }
  0x3a   : > { %853 = vmatprep.subr.mxu0 %v707_v58 }
  0x3b   : > { %854 = vmatpush3.msra.mxu0 %v707_v58 }
  0x3c   : > { %855 = vmatprep.subr.mxu0 %v706_v59 }
  0x3d   : > { %856 = vmatpush3.msra.mxu0 %v706_v59 }
  0x3e   : > { %857 = vmatprep.subr.mxu0 %v705_v60 }
  0x3f   : > { %858 = vmatpush3.msra.mxu0 %v705_v60 }
  0x40   : > { %859 = vmatprep.subr.mxu0 %v704_v61 }
  0x41   : > { %860 = vmatpush3.msra.mxu0 %v704_v61 }
  0x42   : > { %861 = vmatprep.subr.mxu0 %v703_v62 }
  0x43   : > { %862 = vmatpush3.msra.mxu0 %v703_v62 }
  0x44   : > { %863 = vmatprep.subr.mxu0 %v702_v63 }
  0x45   : > { %864 = vmatpush3.msra.mxu0 %v702_v63 }
  0x46   : > { %865 = vmatprep.subr.mxu0 %v701_v0 }
  0x47   : > { %866 = vmatpush3.msra.mxu0 %v701_v0 }
  0x48   : > { %867 = vmatprep.subr.mxu0 %v700_v2 }
  0x49   : > { %868 = vmatpush3.msra.mxu0 %v700_v2 }
  0x4a   : > { %869 = vmatprep.subr.mxu0 %v699_v3 }
  0x4b   : > { %870 = vmatpush3.msra.mxu0 %v699_v3 }
  0x4c   : > { %871 = vmatprep.subr.mxu0 %v698_v5 }
  0x4d   : > { %872 = vmatpush3.msra.mxu0 %v698_v5 }
  0x4e   : > { %874 = vmatmul.mubr.msk.f32.vlgmr.msra.gmra.mxu0 %vm276_vm3, %v281_v6 }
  0xed   : > { %v805_v7 = vpop.f32.mrf.mxu0 }
  0xee   : > { %v840_v8 = vpop.f32.mrf.mxu1 }
  0xef   : > { %v383_v9 = vpop.f32.mrf.mxu0  ;;  %v464_v11 = vadd.f32 %v840_v8, %v805_v7 }
  0xf0   : > { %v458_v10 = vpop.f32.mrf.mxu1 }
  0xf1   : > { %v459_v13 = vadd.f32 %v458_v10, %v383_v9 }
 0x10e   : > { %v875_v12 = vpop.f32.mrf.mxu0 }
 0x10f   : > { %v560_v14 = vadd.f32 %v875_v12, %v464_v11 }
 0x110   : > { %v550_v15 = vpop.f32.mrf.mxu0 }
 0x111   : > { %v559_v16 = vadd.f32 %v550_v15, %v459_v13  ;;  %v571_v17 = vmul.f32 %v560_v14, %v560_v14  ;;  %562 = vst [vmem:[%s233_s20 + $0x8] sm:$0xff] %v560_v14 }
 0x113   : > { %561 = vst [vmem:[%s233_s20] sm:$0xff] %v559_v16  ;;  %v563_v18 = vadd.f32 %v560_v14, %v559_v16  ;;  %v570_v19 = vmul.f32 %v559_v16, %v559_v16 }
 0x115   : > { %v564_v20 = vrot.slane %v563_v18, 4  ;;  %v572_v21 = vadd.f32 %v571_v17, %v570_v19 }
 0x117   : > { %v565_v22 = vadd.f32 %v564_v20, %v563_v18  ;;  %v573_v23 = vrot.slane %v572_v21, 4 }
 0x119   : > { %v566_v24 = vrot.slane %v565_v22, 2  ;;  %v574_v25 = vadd.f32 %v573_v23, %v572_v21 }
 0x11b   : > { %v567_v26 = vadd.f32 %v566_v24, %v565_v22  ;;  %v575_v27 = vrot.slane %v574_v25, 2 }
 0x11d   : > { %v568_v28 = vrot.slane %v567_v26, 1  ;;  %v576_v29 = vadd.f32 %v575_v27, %v574_v25 }
 0x11f   : > { %v577_v30 = vrot.slane %v576_v29, 1  ;;  %v569_v31 = vadd.f32 %v568_v28, %v567_v26 }
 0x121   : > { %v578_v32 = vadd.f32 %v577_v30, %v576_v29 }
 0x123   : > { %v580_v33 = vsel %vm579_vm4, %v569_v31, %v578_v32 }
 0x124   : > { %581 = vst [vmem:[%s238_s22] sm:$0x3] %v580_v33 }
 0x125 PF: > { %s16_s18 = sadd.s32 1, %s890_s18  }
 0x126   : > { %p13_p5 = scmp.ge.s32.totalorder %s16_s18, 4  }
 0x128   :  { %15 = sbr.rel (!%p13_p5) target bundleno = 1 (0x1), region = 80 }

</bundles_post_ra>
